<compile_context>
chip_gen: v7x
topology: tpu7x:2x2x1
jax: 0.10.0
libtpu: 0.0.40
codegen_flags: <defaults>
</compile_context>

<pallas_src>
import jax
import jax.numpy as jnp
import numpy as np
from jax.experimental import pallas as pl
from jax.experimental.pallas import tpu as pltpu

H_IN, W_IN = 12, 13                 # implied by Linear(48*14*15, 1) with padding=1
H_PAD, W_PAD = H_IN + 2, W_IN + 2   # 14, 15
C_IN, C_OUT = 3, 48
F_INT = C_IN * H_IN * W_IN          # 468 interior features after folding


def _fused_linear_kernel(x_ref, w_ref, b_ref, o_ref):
    """Fused conv(1x1)+flatten+fc after weight folding.

    x_ref: (TN, 468) f32 VMEM   -- flattened interior pixels (one batch tile)
    w_ref: (1, 468)  f32 VMEM   -- folded effective weights
    b_ref: (1,)      f32 SMEM   -- folded bias constant (scalar path)
    o_ref: (TN, 1)   f32 VMEM
    """
    prod = x_ref[...] * w_ref[...]                       # VPU, sublane-broadcast of w
    o_ref[...] = jnp.sum(prod, axis=1, keepdims=True) + b_ref[0]


def model_forward(x_nchw, conv_w, conv_b, fc_w, fc_b, *, tn=1024):
    """x_nchw: (N, 3, 12, 13) f32 -> (N, 1) f32 (matches the PyTorch forward)."""
    n = x_nchw.shape[0]

    cw = conv_w.reshape(C_OUT, C_IN).astype(jnp.float32)           # (48, 3)
    cb = conv_b.reshape(C_OUT).astype(jnp.float32)                 # (48,)
    fw = fc_w.reshape(C_OUT, H_PAD, W_PAD).astype(jnp.float32)     # (48, 14, 15) NCHW flatten order
    fb = fc_b.reshape(()).astype(jnp.float32)                      # scalar

    # --- one-time algebraic fold (outside the kernel) ---
    w_eff = jnp.einsum('oc,ohw->chw', cw, fw)                      # (3, 14, 15)
    # padded border pixels only ever see x==0; their conv-bias term is a constant.
    w_int = w_eff[:, 1:1 + H_IN, 1:1 + W_IN].reshape(1, F_INT)     # (1, 468)
    bias_const = jnp.sum(fw * cb[:, None, None]) + fb              # scalar

    # no jnp.pad: reshape is a free bitcast, kernel reads activations straight from HBM
    x_flat = x_nchw.astype(jnp.float32).reshape(n, F_INT)          # (N, 468)
    b_in = bias_const.reshape(1)                                   # (1,) for SMEM

    # batch tile: multiple of 8 sublanes, capped so tiny N doesn't allocate huge blocks
    tn = int(min(tn, max(8, ((n + 7) // 8) * 8)))
    grid = (pl.cdiv(n, tn),)

    cost = pl.CostEstimate(
        flops=2 * n * F_INT,
        transcendentals=0,
        bytes_accessed=(n * F_INT + F_INT + n + 1) * 4,
    )

    return pl.pallas_call(
        _fused_linear_kernel,
        out_shape=jax.ShapeDtypeStruct((n, 1), jnp.float32),
        grid=grid,
        in_specs=[
            pl.BlockSpec((tn, F_INT), lambda i: (i, 0)),           # batch-tiled activations
            pl.BlockSpec((1, F_INT), lambda i: (0, 0)),            # folded weight, resident
            pl.BlockSpec(memory_space=pltpu.MemorySpace.SMEM),     # scalar bias
        ],
        out_specs=pl.BlockSpec((tn, 1), lambda i: (i, 0)),
        compiler_params=pltpu.CompilerParams(
            dimension_semantics=("parallel",),                     # v7x: shard batch over both TCs
        ),
        cost_estimate=cost,
    )(x_flat, w_int, b_in)


def _reference(x, conv_w, conv_b, fc_w, fc_b):
    """Pure-JAX reference of the PyTorch forward (pad -> 1x1 conv -> flatten -> fc)."""
    n = x.shape[0]
    x_pad = jnp.pad(x, ((0, 0), (0, 0), (1, 1), (1, 1)))
    conv = jnp.einsum('oc,nchw->nohw', conv_w.reshape(C_OUT, C_IN), x_pad) \
        + conv_b[None, :, None, None]
    return conv.reshape(n, -1) @ fc_w.T + fc_b


if __name__ == "__main__":
    key = jax.random.PRNGKey(0)
    kx, kx2, kcw, kcb, kfw, kfb = jax.random.split(key, 6)

    # deterministic parameter init (PyTorch-style uniform fan-in bounds)
    conv_bound = 1.0 / np.sqrt(C_IN * 1 * 1)
    conv_w = jax.random.uniform(kcw, (C_OUT, C_IN, 1, 1), jnp.float32,
                                -conv_bound, conv_bound)
    conv_b = jax.random.uniform(kcb, (C_OUT,), jnp.float32, -conv_bound, conv_bound)
    fc_in = C_OUT * H_PAD * W_PAD  # 48 * 14 * 15 = 10080
    fc_bound = 1.0 / np.sqrt(fc_in)
    fc_w = jax.random.uniform(kfw, (1, fc_in), jnp.float32, -fc_bound, fc_bound)
    fc_b = jax.random.uniform(kfb, (1,), jnp.float32, -fc_bound, fc_bound)

    # main small-shape check (batch = 2)
    N = 2
    x1 = jax.random.normal(kx, (N, C_IN, H_IN, W_IN), dtype=jnp.float32)
    out = jax.block_until_ready(model_forward(x1, conv_w, conv_b, fc_w, fc_b))
    ref = _reference(x1, conv_w, conv_b, fc_w, fc_b)
    assert out.shape == (N, 1)
    np.testing.assert_allclose(np.asarray(out), np.asarray(ref), rtol=1e-4, atol=1e-4)

    # exercise the batch grid (multiple tiles + partial last tile)
    N2 = 20
    x2 = jax.random.normal(kx2, (N2, C_IN, H_IN, W_IN), dtype=jnp.float32)
    out2 = jax.block_until_ready(model_forward(x2, conv_w, conv_b, fc_w, fc_b, tn=8))
    ref2 = _reference(x2, conv_w, conv_b, fc_w, fc_b)
    np.testing.assert_allclose(np.asarray(out2), np.asarray(ref2), rtol=1e-4, atol=1e-4)

    print("KERNEL_OK")
</pallas_src>

<mosaic_0001>
module attributes {stable_mosaic.version = 11 : i64} {
  func.func @_fused_linear_kernel(%arg0: i32, %arg1: memref<8x468xf32, #tpu.memory_space<vmem>>, %arg2: memref<1x468xf32, #tpu.memory_space<vmem>>, %arg3: memref<1xf32, #tpu.memory_space<smem>>, %arg4: memref<8x1xf32, #tpu.memory_space<vmem>>) attributes {dimension_semantics = [#tpu.dimension_semantics<parallel>], iteration_bounds = array<i64: 1>, scalar_prefetch = 0 : i64, scratch_operands = 0 : i64, tpu.core_type = #tpu.core_type<tc>, window_params = [{transform_indices = @transform_0, window_bounds = array<i64: 8, 468>}, {pipeline_mode = #tpu.pipeline_mode<synchronous>, transform_indices = @transform_1, window_bounds = array<i64: 1, 468>}, {transform_indices = @transform_2, window_bounds = array<i64: 1>}, {transform_indices = @transform_3, window_bounds = array<i64: 8, 1>}]} {
    %c0 = arith.constant 0 : index
    %c0_0 = arith.constant 0 : index
    %0 = vector.load %arg1[%c0, %c0_0] : memref<8x468xf32, #tpu.memory_space<vmem>>, vector<8x468xf32>
    %c0_1 = arith.constant 0 : index
    %c0_2 = arith.constant 0 : index
    %1 = vector.load %arg2[%c0_1, %c0_2] : memref<1x468xf32, #tpu.memory_space<vmem>>, vector<1x468xf32>
    %2 = vector.broadcast %1 : vector<1x468xf32> to vector<8x468xf32>
    %3 = arith.mulf %0, %2 : vector<8x468xf32>
    %cst = arith.constant dense<0.000000e+00> : vector<8xf32>
    %4 = vector.multi_reduction <add>, %3, %cst [1] : vector<8x468xf32> to vector<8xf32>
    %5 = vector.shape_cast %4 : vector<8xf32> to vector<8x1xf32>
    %c0_3 = arith.constant 0 : index
    %6 = memref.load %arg3[%c0_3] : memref<1xf32, #tpu.memory_space<smem>>
    %7 = vector.broadcast %6 : f32 to vector<8x1xf32>
    %8 = arith.addf %5, %7 : vector<8x1xf32>
    %c0_4 = arith.constant 0 : index
    %c0_5 = arith.constant 0 : index
    %9 = vector.load %arg4[%c0_4, %c0_5] : memref<8x1xf32, #tpu.memory_space<vmem>>, vector<8x1xf32>
    tpu.vector_store %arg4[%c0_4, %c0_5], %8 {strides = array<i32>} : memref<8x1xf32, #tpu.memory_space<vmem>>, vector<8x1xf32>,
    return
  }
  func.func @transform_0(%arg0: i32) -> (i32, i32) {
    %c0_i32 = arith.constant 0 : i32
    %c0_i32_0 = arith.constant 0 : i32
    return %arg0, %c0_i32 : i32, i32
  }
  func.func @transform_1(%arg0: i32) -> (i32, i32) {
    %c0_i32 = arith.constant 0 : i32
    %c0_i32_0 = arith.constant 0 : i32
    %c0_i32_1 = arith.constant 0 : i32
    return %c0_i32, %c0_i32_0 : i32, i32
  }
  func.func @transform_2(%arg0: i32) -> i32 {
    %c0_i32 = arith.constant 0 : i32
    %c0_i32_0 = arith.constant 0 : i32
    return %c0_i32 : i32
  }
  func.func @transform_3(%arg0: i32) -> (i32, i32) {
    %c0_i32 = arith.constant 0 : i32
    %c0_i32_0 = arith.constant 0 : i32
    return %arg0, %c0_i32 : i32, i32
  }
}

</mosaic_0001>

<bundles_post_ra>
// kernel: tpu_custom_call.1
= control target key start
LH: loop header
LB: loop body
LE: loop exit
PB: predicated region body
PF: predicated region fallthrough
CT: control target
= control target key end

     0   :  { %9 = vsyncpa [#allocation4], 0  ;;  %s264_s0 = inlined_call_operand.hbm [shape: f32[2,468], index: 0, kind: input, shape index: {}]   ;;  %s265_s1 = inlined_call_operand.vmem [shape: f32[1,468], index: 1, kind: input, shape index: {}]   ;;  %s266_s2 = inlined_call_operand.<no memory space> [shape: f32[1], index: 2, kind: input, shape index: {}]   ;;  %s267_s3 = inlined_call_operand.vmem [shape: f32[2,1], index: 3, kind: output, shape index: {}]  }
   0x1   :  { %14 = vsyncadd [#allocation4], 384  ;;  %s219_s12 = smov [#allocation3]   ;;  %s195_s16 = scalar_lea.hbm %s264_s0, 128 }
   0x2   :  { %s15_s13 = sshll.u32 %s219_s12, 4  ;;  %p196_p0 = scmp.ne.s32.totalorder %s264_s0, %s195_s16  ;;  %s16_s13 = int_to_ptr.vmem [resolvable:$true] %s15_s13 }
   0x3   :  { %p199_p1 = scmp.lt.u32.totalorder %s195_s16, %s264_s0 }
   0x5   :  { %p201_p2 = pnand %p199_p1, %p196_p0 }
   0x7   :  { %204 = shalt.err (!%p201_p2)
}
   0x8   :  { %s205_s21 = scalar_lea.vmem %s16_s13, 128  ;;  %s209_s22 = scalar_lea.vmem %s16_s13, 512 }
   0x9   :  { %p206_p3 = scmp.ne.s32.totalorder %s16_s13, %s205_s21  ;;  %p210_p4 = scmp.lt.s32.totalorder %s16_s13, %s16_s13 }
   0xa   :  { %p211_p5 = scmp.lt.s32.totalorder %s209_s22, %s205_s21 }
   0xc   :  { %p212_p6 = por %p211_p5, %p210_p4 }
   0xe   :  { %p213_p7 = pnand %p212_p6, %p206_p3 }
  0x10   :  { %216 = shalt.err (!%p213_p7)
}
  0x11   :  { %s220_s23 = smov 128   ;;  %s221_s24 = smov 8  }
  0x12   :  { %21 = dma.hbm_to_vmem [thread:$0]  %s264_s0, 128, %s16_s13, [#allocation4], %s220_s23, %s220_s23, %s221_s24  }
  0x13   :  { %217 = dma.done.wait [#allocation4], 512  }
  0x14   :  { %218 = vsyncadd [#allocation4], 4294966784  ;;  %v35_v0 = vlaneseq  ;;  %v222_v1 = vmov 1983009808   ;;  %v33_v9 = vld [vmem:[%s265_s1] sm:$0xf]  ;;  %v147_v51 = vstv %s266_s2 }
  0x15   :  { %v56_v2 = vunpack.c.l.s4 %v222_v1  ;;  %v29_v19 = vld [vmem:[#allocation3] sm:$0xff]  ;;  %v30_v24 = vld [vmem:[#allocation3 + $0x8] sm:$0xff]  ;;  %v31_v25 = vld [vmem:[#allocation3 + $0x10] sm:$0xff]  ;;  %vm141_vm0 = vcmask 687104   ;;  %vm149_vm1 = vcmask 7168  }
  0x16   :  { %v36_v3 = vshrl.u32 %v35_v0, 7  ;;  %v32_v26 = vld [vmem:[#allocation3 + $0x18] sm:$0xff] }
  0x17   :  { %v57_v4 = vunpack.c.0.s8 %v56_v2 }
  0x18   :  { %v37_v5 = vsub.s32 0, %v36_v3  ;;  %v41_v6 = vsub.s32 1, %v36_v3  ;;  %v45_v7 = vsub.s32 2, %v36_v3  ;;  %v49_v8 = vsub.s32 3, %v36_v3 }
  0x19   :  { %v60_v10 = vsub.s32 %v57_v4, %v36_v3 }
  0x1a   :  { %v38_v11 = vrot.slane %v33_v9, %v37_v5  ;;  %v42_v12 = vrot.slane %v33_v9, %v41_v6  ;;  %v46_v13 = vrot.slane %v33_v9, %v45_v7  ;;  %v50_v14 = vrot.slane %v33_v9, %v49_v8 }
  0x1c   :  { %v51_v15 = vcombine.low %v38_v11, %v42_v12  ;;  %v52_v16 = vcombine.high %v38_v11, %v42_v12  ;;  %v53_v17 = vcombine.low %v46_v13, %v50_v14  ;;  %v54_v18 = vcombine.high %v46_v13, %v50_v14 }
  0x1e   :  { %v61_v20 = vrot.slane %v51_v15, %v60_v10  ;;  %v68_v21 = vrot.slane %v52_v16, %v60_v10  ;;  %v75_v22 = vrot.slane %v53_v17, %v60_v10  ;;  %v82_v23 = vrot.slane %v54_v18, %v60_v10 }
  0x20   :  { %v83_v27 = vcombine.low %v61_v20, %v75_v22  ;;  %v84_v28 = vcombine.high %v61_v20, %v75_v22  ;;  %v85_v29 = vcombine.low %v68_v21, %v82_v23  ;;  %v86_v30 = vcombine.high %v68_v21, %v82_v23 }
  0x22   :  { %v91_v31 = vmul.f32 %v83_v27, %v29_v19  ;;  %v92_v32 = vmul.f32 %v84_v28, %v30_v24  ;;  %v93_v33 = vmul.f32 %v85_v29, %v31_v25  ;;  %v94_v34 = vmul.f32 %v86_v30, %v32_v26 }
  0x24   :  { %v99_v35 = vcombine.low %v91_v31, %v92_v32  ;;  %v100_v36 = vcombine.high %v91_v31, %v92_v32  ;;  %v101_v37 = vcombine.low %v93_v33, %v94_v34  ;;  %v102_v38 = vcombine.high %v93_v33, %v94_v34 }
  0x26   :  { %v109_v39 = vrot.slane %v99_v35, %v60_v10  ;;  %v116_v40 = vrot.slane %v100_v36, %v60_v10  ;;  %v123_v41 = vrot.slane %v101_v37, %v60_v10  ;;  %v130_v42 = vrot.slane %v102_v38, %v60_v10 }
  0x28   :  { %v131_v43 = vcombine.low %v109_v39, %v123_v41  ;;  %v132_v44 = vcombine.high %v109_v39, %v123_v41  ;;  %v133_v45 = vcombine.low %v116_v40, %v130_v42  ;;  %v134_v46 = vcombine.high %v116_v40, %v130_v42 }
  0x2a   :  { %v139_v47 = vadd.f32 %v132_v44, %v131_v43  ;;  %v142_v48 = vsel %vm141_vm0, %v134_v46, 0.0 }
  0x2c   :  { %v140_v49 = vadd.f32 %v139_v47, %v133_v45 }
  0x2e   :  { %v143_v50 = vadd.f32 %v142_v48, %v140_v49 }
  0x30   :  { %144 = vadd.xlane.f32.xlu0 %v143_v50 }
  0xbd   :  { %v145_v52 = vpop.xlane.xlu0 %144 }
  0xbe   :  { %v148_v53 = vadd.f32 %v147_v51, %v145_v52 }
  0xc0   :  { %150 = vst.msk [vmem:[#allocation5] sm:$0xff] %vm149_vm1, %v148_v53 }
  0xc7   :  { %v168_v54 = vld [vmem:[#allocation5] sm:$0x3] }
  0xc8   :  { %169 = vst [vmem:[%s267_s3] sm:$0x3] %v168_v54 }
  0xc9   :  { %186 = vsyncpa [#allocation4], 1 }

</bundles_post_ra>
